<compile_context>
chip_gen: v7x
topology: tpu7x:2x2x1
jax: 0.10.0
libtpu: 0.0.40
codegen_flags: <defaults>
</compile_context>

<pallas_src>
import numpy as np
import jax
import jax.numpy as jnp
from jax import lax
from jax.experimental import pallas as pl
from jax.experimental.pallas import tpu as pltpu


def make_alt_attention_kernel(dim, num_heads, q_tile, seq_len):
    head_dim = dim // num_heads
    scale = dim ** (-0.5)              # NOTE: PyTorch module scales by full dim, not head_dim
    neg_min = float(jnp.finfo(jnp.float32).min)

    def kernel(x_ref, mask_ref,
               wq_ref, bq_ref, wk_ref, wv_ref, wproj_ref, bproj_ref,
               o_ref, k_scr, v_scr, ctx_scr):
        qt = pl.program_id(1)

        # ---- K/V projection of the full sequence: once per batch row ----------------
        @pl.when(qt == 0)
        def _():
            xs = x_ref[0]                                          # (S, D) bf16
            k_scr[...] = jnp.dot(xs, wk_ref[...],
                                 preferred_element_type=jnp.float32).astype(jnp.bfloat16)
            v_scr[...] = jnp.dot(xs, wv_ref[...],
                                 preferred_element_type=jnp.float32).astype(jnp.bfloat16)

        # ---- Q projection for this query tile (sliced from the resident x block) ----
        q_start = pl.multiple_of(qt * q_tile, q_tile)
        xq = x_ref[0, pl.ds(q_start, q_tile), :]                   # (TQ, D) bf16
        q = jnp.dot(xq, wq_ref[...], preferred_element_type=jnp.float32) + bq_ref[...]
        q_bf = (q * scale).astype(jnp.bfloat16)                    # fold scale into q

        keep = mask_ref[0] > 0.5                                   # (1, S), broadcasts over TQ

        def attend(qh, kh, vh):
            # scores: contract head_dim of both operands directly (no k.T relayout)
            s = lax.dot_general(qh, kh, (((1,), (1,)), ((), ())),
                                preferred_element_type=jnp.float32)      # (TQ, S) f32
            s = jnp.where(keep, s, neg_min)              # masked_fill semantics (NaN-safe)
            s = s - jnp.max(s, axis=-1, keepdims=True)
            p = jnp.exp(s)
            p = p * pl.reciprocal(jnp.sum(p, axis=-1, keepdims=True), approx=True)
            return jnp.dot(p.astype(jnp.bfloat16), vh,
                           preferred_element_type=jnp.float32).astype(jnp.bfloat16)

        if head_dim % 128 == 0:
            # lane-aligned heads: fori_loop bounds the (TQ, S) temporaries' live ranges
            def body(h, carry):
                lo = pl.multiple_of(h * head_dim, head_dim)
                ctx_scr[:, pl.ds(lo, head_dim)] = attend(
                    lax.dynamic_slice_in_dim(q_bf, lo, head_dim, axis=1),
                    k_scr[:, pl.ds(lo, head_dim)],
                    v_scr[:, pl.ds(lo, head_dim)])
                return carry
            lax.fori_loop(0, num_heads, body, 0)
        else:
            for h in range(num_heads):
                lo = h * head_dim
                ctx_scr[:, lo:lo + head_dim] = attend(
                    q_bf[:, lo:lo + head_dim],
                    k_scr[:, lo:lo + head_dim],
                    v_scr[:, lo:lo + head_dim])

        # ---- one full-width output projection (contraction K = D) --------------------
        out = jnp.dot(ctx_scr[...], wproj_ref[...],
                      preferred_element_type=jnp.float32) + bproj_ref[...]
        o_ref[0] = out.astype(o_ref.dtype)

    return kernel


def _choose_q_tile(seq_len, max_tile=512):
    """Largest divisor of seq_len <= max_tile, stepping in multiples of 16 (bf16 sublane
    packing); falls back to multiples of 8, else the full sequence."""
    if seq_len <= max_tile:
        return seq_len
    for step in (16, 8):
        for t in range(max_tile - max_tile % step, step - 1, -step):
            if seq_len % t == 0:
                return t
    return seq_len


def _qkv_permutation(dim, num_heads):
    """nn.Linear(dim, 3*dim) + view(..., H, 3*dh) puts output columns in per-head-
    interleaved order [q0 k0 v0 | q1 k1 v1 | ...]; re-order to [Q_all | K_all | V_all]."""
    dh = dim // num_heads
    return np.concatenate([
        np.arange(h * 3 * dh + s * dh, h * 3 * dh + (s + 1) * dh)
        for s in range(3) for h in range(num_heads)])


def _resident_spec(shape, index_map):
    """Single-buffered BlockSpec for blocks whose index is constant or changes only
    with the outer (batch) grid axis — halves their VMEM footprint."""
    if hasattr(pl, "Buffered"):
        try:
            return pl.BlockSpec(shape, index_map, pipeline_mode=pl.Buffered(1))
        except TypeError:            # older Pallas without pipeline_mode: fall back cleanly
            pass
    return pl.BlockSpec(shape, index_map)


def _vmem_limit_bytes():
    """~3/4 of physical VMEM (≈48 MiB on v7x, ≈96 MiB on v5e/v6e); conservative fallback."""
    try:
        cap = int(pltpu.get_tpu_info().vmem_capacity_bytes)
    except Exception:
        cap = 64 * 1024 * 1024
    return int(min(cap * 3 // 4, 112 * 1024 * 1024))


def alt_attention(x, mask, wqkv, bqkv, wproj, bproj, *, num_heads, q_tile=None):
    """x: (B, S, D) f32; mask: (B, S) bool (True = keep) or None.
    wqkv: (D, 3D), bqkv: (3D,), wproj: (D, D), bproj: (D,)  — (in, out) layout."""
    B, S, D = x.shape
    tq = q_tile if q_tile is not None else _choose_q_tile(S)
    assert S % tq == 0
    n_q = S // tq

    # Pre-permute QKV columns to contiguous [Q | K | V] slabs (lane-friendly slices).
    perm = _qkv_permutation(D, num_heads)
    wqkv_p = jnp.asarray(wqkv)[:, perm]
    bqkv_p = jnp.asarray(bqkv)[perm]

    w_q = wqkv_p[:, :D].astype(jnp.bfloat16)
    w_k = wqkv_p[:, D:2 * D].astype(jnp.bfloat16)
    w_v = wqkv_p[:, 2 * D:].astype(jnp.bfloat16)
    b_q = bqkv_p[:D].reshape(1, D).astype(jnp.float32)
    # b_k adds a per-query-row constant to all scores -> softmax-invariant -> dropped.
    # b_v contributes exactly b_v to every context row (softmax rows sum to 1), so fold
    # b_v @ W_proj into the projection bias.
    b_v = bqkv_p[2 * D:].astype(jnp.float32)
    wproj_f32 = jnp.asarray(wproj).astype(jnp.float32)
    w_p = jnp.asarray(wproj).astype(jnp.bfloat16)
    b_p = (jnp.asarray(bproj).astype(jnp.float32) + b_v @ wproj_f32).reshape(1, D)

    x_bf = x.astype(jnp.bfloat16)
    if mask is None:
        mask_f = jnp.ones((B, 1, S), dtype=jnp.float32)
    else:
        mask_f = mask.astype(jnp.float32).reshape(B, 1, S)

    kernel = make_alt_attention_kernel(D, num_heads, tq, S)

    # TODO(synk): alibi_bias additive term and attn_drop (dropout > 0) not plumbed in
    # (module defaults are None / 0).
    # TODO(synk): for S >~ 4K on v7x switch to flash-style key tiling (online softmax)
    # so the (TQ, S) score tile + (S, D) K/V cache don't pressure 64 MiB VMEM.
    # TODO(synk): on v7x with B == 1, split the q-tile axis into (2, n_q // 2) and mark
    # the outer size-2 axis "parallel" so both TensorCores stay busy.

    return pl.pallas_call(
        kernel,
        out_shape=jax.ShapeDtypeStruct((B, S, D), jnp.float32),
        grid_spec=pltpu.PrefetchScalarGridSpec(
            num_scalar_prefetch=0,
            grid=(B, n_q),
            in_specs=[
                _resident_spec((1, S, D), lambda b, q: (b, 0, 0)),   # x: full seq (Q tile sliced in-kernel)
                pl.BlockSpec((1, 1, S), lambda b, q: (b, 0, 0)),     # mask
                _resident_spec((D, D), lambda b, q: (0, 0)),         # W_q
                _resident_spec((1, D), lambda b, q: (0, 0)),         # b_q
                _resident_spec((D, D), lambda b, q: (0, 0)),         # W_k
                _resident_spec((D, D), lambda b, q: (0, 0)),         # W_v
                _resident_spec((D, D), lambda b, q: (0, 0)),         # W_proj
                _resident_spec((1, D), lambda b, q: (0, 0)),         # b_proj (+ b_v @ W_proj)
            ],
            out_specs=pl.BlockSpec((1, tq, D), lambda b, q: (b, q, 0)),
            scratch_shapes=[
                pltpu.VMEM((S, D), jnp.bfloat16),    # K cache (per batch row)
                pltpu.VMEM((S, D), jnp.bfloat16),    # V cache (per batch row)
                pltpu.VMEM((tq, D), jnp.bfloat16),   # per-tile context (all heads)
            ],
        ),
        compiler_params=pltpu.CompilerParams(
            # K/V cache is carried across the query-tile axis -> it must be "arbitrary";
            # the batch axis stays "parallel" for megacore sharding.
            dimension_semantics=("parallel", "arbitrary"),
            vmem_limit_bytes=_vmem_limit_bytes(),
        ),
    )(x_bf, mask_f, w_q, b_q, w_k, w_v, w_p, b_p)


def alt_attention_reference(x, mask, wqkv, bqkv, wproj, bproj, *, num_heads):
    """Pure-JAX f32 reference mirroring the PyTorch forward."""
    B, S, D = x.shape
    dh = D // num_heads
    scale = D ** (-0.5)
    qkv = x @ wqkv + bqkv                                    # (B, S, 3D)
    qkv = qkv.reshape(B, S, num_heads, 3 * dh).transpose(0, 2, 1, 3)
    q, k, v = qkv[..., :dh], qkv[..., dh:2 * dh], qkv[..., 2 * dh:]
    attn = jnp.einsum("bhqd,bhkd->bhqk", q, k) * scale
    if mask is not None:
        m = mask[:, None, None, :]
        attn = jnp.where(m, attn, jnp.finfo(attn.dtype).min)
    attn = jax.nn.softmax(attn, axis=-1)
    ctx = jnp.einsum("bhqk,bhkd->bhqd", attn, v)
    ctx = ctx.transpose(0, 2, 1, 3).reshape(B, S, D)
    return ctx @ wproj + bproj


if __name__ == "__main__":
    B, S, D, H = 2, 8, 32, 4

    key = jax.random.PRNGKey(0)
    kx, kw1, kb1, kw2, kb2, km = jax.random.split(key, 6)

    x = jax.random.normal(kx, (B, S, D), dtype=jnp.float32)
    # nn.Linear(dim, 3*dim): weight (3D, D) -> transposed to (D, 3D)
    wqkv = (jax.random.normal(kw1, (3 * D, D), dtype=jnp.float32) * 0.05).T
    bqkv = jax.random.normal(kb1, (3 * D,), dtype=jnp.float32) * 0.05
    # nn.Linear(dim, dim): weight (D, D) -> transposed to (D, D)
    wproj = (jax.random.normal(kw2, (D, D), dtype=jnp.float32) * 0.05).T
    bproj = jax.random.normal(kb2, (D,), dtype=jnp.float32) * 0.05

    # boolean mask (True = attend); make sure every row has at least one True
    mask = jax.random.bernoulli(km, 0.8, (B, S))
    mask = mask.at[:, 0].set(True)

    out = alt_attention(x, mask, wqkv, bqkv, wproj, bproj, num_heads=H)
    out = jax.block_until_ready(out)

    ref = alt_attention_reference(x, mask, wqkv, bqkv, wproj, bproj, num_heads=H)
    # bf16 MXU operands with f32 accumulation (+ approx-reciprocal softmax) vs the f32
    # reference -> bf16-appropriate tolerance.
    np.testing.assert_allclose(np.asarray(out), np.asarray(ref), rtol=2e-2, atol=2e-2)

    print("KERNEL_OK")
</pallas_src>

<mosaic_0001>
module attributes {stable_mosaic.version = 11 : i64} {
  func.func @kernel(%arg0: i32, %arg1: i32, %arg2: memref<1x8x32xbf16, #tpu.memory_space<vmem>>, %arg3: memref<1x1x8xf32, #tpu.memory_space<vmem>>, %arg4: memref<32x32xbf16, #tpu.memory_space<vmem>>, %arg5: memref<1x32xf32, #tpu.memory_space<vmem>>, %arg6: memref<32x32xbf16, #tpu.memory_space<vmem>>, %arg7: memref<32x32xbf16, #tpu.memory_space<vmem>>, %arg8: memref<32x32xbf16, #tpu.memory_space<vmem>>, %arg9: memref<1x32xf32, #tpu.memory_space<vmem>>, %arg10: memref<1x8x32xf32, #tpu.memory_space<vmem>>, %arg11: memref<8x32xbf16, #tpu.memory_space<vmem>>, %arg12: memref<8x32xbf16, #tpu.memory_space<vmem>>, %arg13: memref<8x32xbf16, #tpu.memory_space<vmem>>) attributes {dimension_semantics = [#tpu.dimension_semantics<parallel>, #tpu.dimension_semantics<arbitrary>], iteration_bounds = array<i64: 2, 1>, scalar_prefetch = 0 : i64, scratch_operands = 3 : i64, tpu.core_type = #tpu.core_type<tc>, window_params = [{pipeline_mode = #tpu.pipeline_mode<synchronous>, transform_indices = @transform_0, window_bounds = array<i64: 1, 8, 32>}, {transform_indices = @transform_1, window_bounds = array<i64: 1, 1, 8>}, {pipeline_mode = #tpu.pipeline_mode<synchronous>, transform_indices = @transform_2, window_bounds = array<i64: 32, 32>}, {pipeline_mode = #tpu.pipeline_mode<synchronous>, transform_indices = @transform_3, window_bounds = array<i64: 1, 32>}, {pipeline_mode = #tpu.pipeline_mode<synchronous>, transform_indices = @transform_4, window_bounds = array<i64: 32, 32>}, {pipeline_mode = #tpu.pipeline_mode<synchronous>, transform_indices = @transform_5, window_bounds = array<i64: 32, 32>}, {pipeline_mode = #tpu.pipeline_mode<synchronous>, transform_indices = @transform_6, window_bounds = array<i64: 32, 32>}, {pipeline_mode = #tpu.pipeline_mode<synchronous>, transform_indices = @transform_7, window_bounds = array<i64: 1, 32>}, {transform_indices = @transform_8, window_bounds = array<i64: 1, 8, 32>}]} {
    %c0_i32 = arith.constant 0 : i32
    %0 = arith.cmpi eq, %arg1, %c0_i32 : i32
    %1 = arith.extui %0 : i1 to i32
    %c0_i32_0 = arith.constant 0 : i32
    %2 = arith.cmpi ne, %1, %c0_i32_0 : i32
    scf.if %2 {
      %c0_62 = arith.constant 0 : index
      %c0_63 = arith.constant 0 : index
      %c0_64 = arith.constant 0 : index
      %117 = vector.load %arg2[%c0_62, %c0_63, %c0_64] : memref<1x8x32xbf16, #tpu.memory_space<vmem>>, vector<1x8x32xbf16>
      %118 = vector.shape_cast %117 : vector<1x8x32xbf16> to vector<8x32xbf16>
      %c0_65 = arith.constant 0 : index
      %c0_66 = arith.constant 0 : index
      %119 = vector.load %arg6[%c0_65, %c0_66] : memref<32x32xbf16, #tpu.memory_space<vmem>>, vector<32x32xbf16>
      %cst_67 = arith.constant dense<0.000000e+00> : vector<8x32xf32>
      %120 = tpu.matmul %118, %119, %cst_67 {dimension_numbers = #tpu.dot_dimension_numbers<[1], [0], [0], [1], [0, 0, 1, 1], [], []>} : vector<8x32xbf16>, vector<32x32xbf16>, vector<8x32xf32> -> vector<8x32xf32>
      %121 = arith.truncf %120 : vector<8x32xf32> to vector<8x32xbf16>
      %c0_68 = arith.constant 0 : index
      %c0_69 = arith.constant 0 : index
      %122 = vector.load %arg11[%c0_68, %c0_69] : memref<8x32xbf16, #tpu.memory_space<vmem>>, vector<8x32xbf16>
      tpu.vector_store %arg11[%c0_68, %c0_69], %121 {strides = array<i32>} : memref<8x32xbf16, #tpu.memory_space<vmem>>, vector<8x32xbf16>,
      %c0_70 = arith.constant 0 : index
      %c0_71 = arith.constant 0 : index
      %123 = vector.load %arg7[%c0_70, %c0_71] : memref<32x32xbf16, #tpu.memory_space<vmem>>, vector<32x32xbf16>
      %cst_72 = arith.constant dense<0.000000e+00> : vector<8x32xf32>
      %124 = tpu.matmul %118, %123, %cst_72 {dimension_numbers = #tpu.dot_dimension_numbers<[1], [0], [0], [1], [0, 0, 1, 1], [], []>} : vector<8x32xbf16>, vector<32x32xbf16>, vector<8x32xf32> -> vector<8x32xf32>
      %125 = arith.truncf %124 : vector<8x32xf32> to vector<8x32xbf16>
      %c0_73 = arith.constant 0 : index
      %c0_74 = arith.constant 0 : index
      %126 = vector.load %arg12[%c0_73, %c0_74] : memref<8x32xbf16, #tpu.memory_space<vmem>>, vector<8x32xbf16>
      tpu.vector_store %arg12[%c0_73, %c0_74], %125 {strides = array<i32>} : memref<8x32xbf16, #tpu.memory_space<vmem>>, vector<8x32xbf16>,
    } else {
    }
    %c8_i32 = arith.constant 8 : i32
    %3 = arith.muli %arg1, %c8_i32 : i32
    %4 = tpu.assume_multiple %3, 8 : i32
    %c0 = arith.constant 0 : index
    %5 = arith.index_cast %4 : i32 to index
    %c0_1 = arith.constant 0 : index
    %6 = vector.load %arg2[%c0, %5, %c0_1] : memref<1x8x32xbf16, #tpu.memory_space<vmem>>, vector<1x8x32xbf16>
    %7 = vector.shape_cast %6 : vector<1x8x32xbf16> to vector<8x32xbf16>
    %c0_2 = arith.constant 0 : index
    %c0_3 = arith.constant 0 : index
    %8 = vector.load %arg4[%c0_2, %c0_3] : memref<32x32xbf16, #tpu.memory_space<vmem>>, vector<32x32xbf16>
    %cst = arith.constant dense<0.000000e+00> : vector<8x32xf32>
    %9 = tpu.matmul %7, %8, %cst {dimension_numbers = #tpu.dot_dimension_numbers<[1], [0], [0], [1], [0, 0, 1, 1], [], []>} : vector<8x32xbf16>, vector<32x32xbf16>, vector<8x32xf32> -> vector<8x32xf32>
    %c0_4 = arith.constant 0 : index
    %c0_5 = arith.constant 0 : index
    %10 = vector.load %arg5[%c0_4, %c0_5] : memref<1x32xf32, #tpu.memory_space<vmem>>, vector<1x32xf32>
    %11 = vector.broadcast %10 : vector<1x32xf32> to vector<8x32xf32>
    %12 = arith.addf %9, %11 : vector<8x32xf32>
    %cst_6 = arith.constant 0.176776692 : f32
    %13 = vector.broadcast %cst_6 : f32 to vector<8x32xf32>
    %14 = arith.mulf %12, %13 : vector<8x32xf32>
    %15 = arith.truncf %14 : vector<8x32xf32> to vector<8x32xbf16>
    %c0_7 = arith.constant 0 : index
    %c0_8 = arith.constant 0 : index
    %c0_9 = arith.constant 0 : index
    %16 = vector.load %arg3[%c0_7, %c0_8, %c0_9] : memref<1x1x8xf32, #tpu.memory_space<vmem>>, vector<1x1x8xf32>
    %17 = vector.shape_cast %16 : vector<1x1x8xf32> to vector<1x8xf32>
    %cst_10 = arith.constant 5.000000e-01 : f32
    %18 = vector.broadcast %cst_10 : f32 to vector<1x8xf32>
    %19 = arith.cmpf ogt, %17, %18 : vector<1x8xf32>
    %20 = vector.extract_strided_slice %15 {offsets = [0, 0], sizes = [8, 8], strides = [1, 1]} : vector<8x32xbf16> to vector<8x8xbf16>
    %c0_11 = arith.constant 0 : index
    %c0_12 = arith.constant 0 : index
    %21 = vector.load %arg11[%c0_11, %c0_12] : memref<8x32xbf16, #tpu.memory_space<vmem>>, vector<8x8xbf16>
    %c0_13 = arith.constant 0 : index
    %c0_14 = arith.constant 0 : index
    %22 = vector.load %arg12[%c0_13, %c0_14] : memref<8x32xbf16, #tpu.memory_space<vmem>>, vector<8x8xbf16>
    %cst_15 = arith.constant dense<0.000000e+00> : vector<8x8xf32>
    %23 = tpu.matmul %20, %21, %cst_15 {dimension_numbers = #tpu.dot_dimension_numbers<[1], [1], [0], [0], [0, 0, 1, 0], [], []>} : vector<8x8xbf16>, vector<8x8xbf16>, vector<8x8xf32> -> vector<8x8xf32>
    %cst_16 = arith.constant -3.40282347E+38 : f32
    %24 = vector.shape_cast %19 : vector<1x8xi1> to vector<1x8xi1>
    %25 = vector.broadcast %24 : vector<1x8xi1> to vector<8x8xi1>
    %26 = vector.broadcast %cst_16 : f32 to vector<8x8xf32>
    %27 = arith.select %25, %23, %26 : vector<8x8xi1>, vector<8x8xf32>
    %cst_17 = arith.constant dense<0xFF800000> : vector<8xf32>
    %28 = vector.multi_reduction <maximumf>, %27, %cst_17 [1] : vector<8x8xf32> to vector<8xf32>
    %29 = vector.shape_cast %28 : vector<8xf32> to vector<8x1xf32>
    %30 = vector.broadcast %29 : vector<8x1xf32> to vector<8x8xf32>
    %31 = arith.subf %27, %30 : vector<8x8xf32>
    %32 = math.exp %31 : vector<8x8xf32>
    %cst_18 = arith.constant dense<0.000000e+00> : vector<8xf32>
    %33 = vector.multi_reduction <add>, %32, %cst_18 [1] : vector<8x8xf32> to vector<8xf32>
    %34 = vector.shape_cast %33 : vector<8xf32> to vector<8x1xf32>
    %35 = tpu.reciprocal %34 {approx = true} : vector<8x1xf32> -> vector<8x1xf32>
    %36 = vector.broadcast %35 : vector<8x1xf32> to vector<8x8xf32>
    %37 = arith.mulf %32, %36 : vector<8x8xf32>
    %38 = arith.truncf %37 : vector<8x8xf32> to vector<8x8xbf16>
    %cst_19 = arith.constant dense<0.000000e+00> : vector<8x8xf32>
    %39 = tpu.matmul %38, %22, %cst_19 {dimension_numbers = #tpu.dot_dimension_numbers<[1], [0], [0], [1], [0, 0, 1, 1], [], []>} : vector<8x8xbf16>, vector<8x8xbf16>, vector<8x8xf32> -> vector<8x8xf32>
    %40 = arith.truncf %39 : vector<8x8xf32> to vector<8x8xbf16>
    %c0_20 = arith.constant 0 : index
    %c0_21 = arith.constant 0 : index
    %41 = vector.load %arg13[%c0_20, %c0_21] : memref<8x32xbf16, #tpu.memory_space<vmem>>, vector<8x8xbf16>
    tpu.vector_store %arg13[%c0_20, %c0_21], %40 {strides = array<i32>} : memref<8x32xbf16, #tpu.memory_space<vmem>>, vector<8x8xbf16>,
    %42 = vector.extract_strided_slice %15 {offsets = [0, 8], sizes = [8, 8], strides = [1, 1]} : vector<8x32xbf16> to vector<8x8xbf16>
    %c0_22 = arith.constant 0 : index
    %c8 = arith.constant 8 : index
    %43 = vector.load %arg11[%c0_22, %c8] : memref<8x32xbf16, #tpu.memory_space<vmem>>, vector<8x8xbf16>
    %c0_23 = arith.constant 0 : index
    %c8_24 = arith.constant 8 : index
    %44 = vector.load %arg12[%c0_23, %c8_24] : memref<8x32xbf16, #tpu.memory_space<vmem>>, vector<8x8xbf16>
    %cst_25 = arith.constant dense<0.000000e+00> : vector<8x8xf32>
    %45 = tpu.matmul %42, %43, %cst_25 {dimension_numbers = #tpu.dot_dimension_numbers<[1], [1], [0], [0], [0, 0, 1, 0], [], []>} : vector<8x8xbf16>, vector<8x8xbf16>, vector<8x8xf32> -> vector<8x8xf32>
    %cst_26 = arith.constant -3.40282347E+38 : f32
    %46 = vector.shape_cast %19 : vector<1x8xi1> to vector<1x8xi1>
    %47 = vector.broadcast %46 : vector<1x8xi1> to vector<8x8xi1>
    %48 = vector.broadcast %cst_26 : f32 to vector<8x8xf32>
    %49 = arith.select %47, %45, %48 : vector<8x8xi1>, vector<8x8xf32>
    %cst_27 = arith.constant dense<0xFF800000> : vector<8xf32>
    %50 = vector.multi_reduction <maximumf>, %49, %cst_27 [1] : vector<8x8xf32> to vector<8xf32>
    %51 = vector.shape_cast %50 : vector<8xf32> to vector<8x1xf32>
    %52 = vector.broadcast %51 : vector<8x1xf32> to vector<8x8xf32>
    %53 = arith.subf %49, %52 : vector<8x8xf32>
    %54 = math.exp %53 : vector<8x8xf32>
    %cst_28 = arith.constant dense<0.000000e+00> : vector<8xf32>
    %55 = vector.multi_reduction <add>, %54, %cst_28 [1] : vector<8x8xf32> to vector<8xf32>
    %56 = vector.shape_cast %55 : vector<8xf32> to vector<8x1xf32>
    %57 = tpu.reciprocal %56 {approx = true} : vector<8x1xf32> -> vector<8x1xf32>
    %58 = vector.broadcast %57 : vector<8x1xf32> to vector<8x8xf32>
    %59 = arith.mulf %54, %58 : vector<8x8xf32>
    %60 = arith.truncf %59 : vector<8x8xf32> to vector<8x8xbf16>
    %cst_29 = arith.constant dense<0.000000e+00> : vector<8x8xf32>
    %61 = tpu.matmul %60, %44, %cst_29 {dimension_numbers = #tpu.dot_dimension_numbers<[1], [0], [0], [1], [0, 0, 1, 1], [], []>} : vector<8x8xbf16>, vector<8x8xbf16>, vector<8x8xf32> -> vector<8x8xf32>
    %62 = arith.truncf %61 : vector<8x8xf32> to vector<8x8xbf16>
    %c0_30 = arith.constant 0 : index
    %c8_31 = arith.constant 8 : index
    %63 = vector.load %arg13[%c0_30, %c8_31] : memref<8x32xbf16, #tpu.memory_space<vmem>>, vector<8x8xbf16>
    tpu.vector_store %arg13[%c0_30, %c8_31], %62 {strides = array<i32>} : memref<8x32xbf16, #tpu.memory_space<vmem>>, vector<8x8xbf16>,
    %64 = vector.extract_strided_slice %15 {offsets = [0, 16], sizes = [8, 8], strides = [1, 1]} : vector<8x32xbf16> to vector<8x8xbf16>
    %c0_32 = arith.constant 0 : index
    %c16 = arith.constant 16 : index
    %65 = vector.load %arg11[%c0_32, %c16] : memref<8x32xbf16, #tpu.memory_space<vmem>>, vector<8x8xbf16>
    %c0_33 = arith.constant 0 : index
    %c16_34 = arith.constant 16 : index
    %66 = vector.load %arg12[%c0_33, %c16_34] : memref<8x32xbf16, #tpu.memory_space<vmem>>, vector<8x8xbf16>
    %cst_35 = arith.constant dense<0.000000e+00> : vector<8x8xf32>
    %67 = tpu.matmul %64, %65, %cst_35 {dimension_numbers = #tpu.dot_dimension_numbers<[1], [1], [0], [0], [0, 0, 1, 0], [], []>} : vector<8x8xbf16>, vector<8x8xbf16>, vector<8x8xf32> -> vector<8x8xf32>
    %cst_36 = arith.constant -3.40282347E+38 : f32
    %68 = vector.shape_cast %19 : vector<1x8xi1> to vector<1x8xi1>
    %69 = vector.broadcast %68 : vector<1x8xi1> to vector<8x8xi1>
    %70 = vector.broadcast %cst_36 : f32 to vector<8x8xf32>
    %71 = arith.select %69, %67, %70 : vector<8x8xi1>, vector<8x8xf32>
    %cst_37 = arith.constant dense<0xFF800000> : vector<8xf32>
    %72 = vector.multi_reduction <maximumf>, %71, %cst_37 [1] : vector<8x8xf32> to vector<8xf32>
    %73 = vector.shape_cast %72 : vector<8xf32> to vector<8x1xf32>
    %74 = vector.broadcast %73 : vector<8x1xf32> to vector<8x8xf32>
    %75 = arith.subf %71, %74 : vector<8x8xf32>
    %76 = math.exp %75 : vector<8x8xf32>
    %cst_38 = arith.constant dense<0.000000e+00> : vector<8xf32>
    %77 = vector.multi_reduction <add>, %76, %cst_38 [1] : vector<8x8xf32> to vector<8xf32>
    %78 = vector.shape_cast %77 : vector<8xf32> to vector<8x1xf32>
    %79 = tpu.reciprocal %78 {approx = true} : vector<8x1xf32> -> vector<8x1xf32>
    %80 = vector.broadcast %79 : vector<8x1xf32> to vector<8x8xf32>
    %81 = arith.mulf %76, %80 : vector<8x8xf32>
    %82 = arith.truncf %81 : vector<8x8xf32> to vector<8x8xbf16>
    %cst_39 = arith.constant dense<0.000000e+00> : vector<8x8xf32>
    %83 = tpu.matmul %82, %66, %cst_39 {dimension_numbers = #tpu.dot_dimension_numbers<[1], [0], [0], [1], [0, 0, 1, 1], [], []>} : vector<8x8xbf16>, vector<8x8xbf16>, vector<8x8xf32> -> vector<8x8xf32>
    %84 = arith.truncf %83 : vector<8x8xf32> to vector<8x8xbf16>
    %c0_40 = arith.constant 0 : index
    %c16_41 = arith.constant 16 : index
    %85 = vector.load %arg13[%c0_40, %c16_41] : memref<8x32xbf16, #tpu.memory_space<vmem>>, vector<8x8xbf16>
    tpu.vector_store %arg13[%c0_40, %c16_41], %84 {strides = array<i32>} : memref<8x32xbf16, #tpu.memory_space<vmem>>, vector<8x8xbf16>,
    %86 = vector.extract_strided_slice %15 {offsets = [0, 24], sizes = [8, 8], strides = [1, 1]} : vector<8x32xbf16> to vector<8x8xbf16>
    %c0_42 = arith.constant 0 : index
    %c24 = arith.constant 24 : index
    %87 = vector.load %arg11[%c0_42, %c24] : memref<8x32xbf16, #tpu.memory_space<vmem>>, vector<8x8xbf16>
    %c0_43 = arith.constant 0 : index
    %c24_44 = arith.constant 24 : index
    %88 = vector.load %arg12[%c0_43, %c24_44] : memref<8x32xbf16, #tpu.memory_space<vmem>>, vector<8x8xbf16>
    %cst_45 = arith.constant dense<0.000000e+00> : vector<8x8xf32>
    %89 = tpu.matmul %86, %87, %cst_45 {dimension_numbers = #tpu.dot_dimension_numbers<[1], [1], [0], [0], [0, 0, 1, 0], [], []>} : vector<8x8xbf16>, vector<8x8xbf16>, vector<8x8xf32> -> vector<8x8xf32>
    %cst_46 = arith.constant -3.40282347E+38 : f32
    %90 = vector.shape_cast %19 : vector<1x8xi1> to vector<1x8xi1>
    %91 = vector.broadcast %90 : vector<1x8xi1> to vector<8x8xi1>
    %92 = vector.broadcast %cst_46 : f32 to vector<8x8xf32>
    %93 = arith.select %91, %89, %92 : vector<8x8xi1>, vector<8x8xf32>
    %cst_47 = arith.constant dense<0xFF800000> : vector<8xf32>
    %94 = vector.multi_reduction <maximumf>, %93, %cst_47 [1] : vector<8x8xf32> to vector<8xf32>
    %95 = vector.shape_cast %94 : vector<8xf32> to vector<8x1xf32>
    %96 = vector.broadcast %95 : vector<8x1xf32> to vector<8x8xf32>
    %97 = arith.subf %93, %96 : vector<8x8xf32>
    %98 = math.exp %97 : vector<8x8xf32>
    %cst_48 = arith.constant dense<0.000000e+00> : vector<8xf32>
    %99 = vector.multi_reduction <add>, %98, %cst_48 [1] : vector<8x8xf32> to vector<8xf32>
    %100 = vector.shape_cast %99 : vector<8xf32> to vector<8x1xf32>
    %101 = tpu.reciprocal %100 {approx = true} : vector<8x1xf32> -> vector<8x1xf32>
    %102 = vector.broadcast %101 : vector<8x1xf32> to vector<8x8xf32>
    %103 = arith.mulf %98, %102 : vector<8x8xf32>
    %104 = arith.truncf %103 : vector<8x8xf32> to vector<8x8xbf16>
    %cst_49 = arith.constant dense<0.000000e+00> : vector<8x8xf32>
    %105 = tpu.matmul %104, %88, %cst_49 {dimension_numbers = #tpu.dot_dimension_numbers<[1], [0], [0], [1], [0, 0, 1, 1], [], []>} : vector<8x8xbf16>, vector<8x8xbf16>, vector<8x8xf32> -> vector<8x8xf32>
    %106 = arith.truncf %105 : vector<8x8xf32> to vector<8x8xbf16>
    %c0_50 = arith.constant 0 : index
    %c24_51 = arith.constant 24 : index
    %107 = vector.load %arg13[%c0_50, %c24_51] : memref<8x32xbf16, #tpu.memory_space<vmem>>, vector<8x8xbf16>
    tpu.vector_store %arg13[%c0_50, %c24_51], %106 {strides = array<i32>} : memref<8x32xbf16, #tpu.memory_space<vmem>>, vector<8x8xbf16>,
    %c0_52 = arith.constant 0 : index
    %c0_53 = arith.constant 0 : index
    %108 = vector.load %arg13[%c0_52, %c0_53] : memref<8x32xbf16, #tpu.memory_space<vmem>>, vector<8x32xbf16>
    %c0_54 = arith.constant 0 : index
    %c0_55 = arith.constant 0 : index
    %109 = vector.load %arg8[%c0_54, %c0_55] : memref<32x32xbf16, #tpu.memory_space<vmem>>, vector<32x32xbf16>
    %cst_56 = arith.constant dense<0.000000e+00> : vector<8x32xf32>
    %110 = tpu.matmul %108, %109, %cst_56 {dimension_numbers = #tpu.dot_dimension_numbers<[1], [0], [0], [1], [0, 0, 1, 1], [], []>} : vector<8x32xbf16>, vector<32x32xbf16>, vector<8x32xf32> -> vector<8x32xf32>
    %c0_57 = arith.constant 0 : index
    %c0_58 = arith.constant 0 : index
    %111 = vector.load %arg9[%c0_57, %c0_58] : memref<1x32xf32, #tpu.memory_space<vmem>>, vector<1x32xf32>
    %112 = vector.broadcast %111 : vector<1x32xf32> to vector<8x32xf32>
    %113 = arith.addf %110, %112 : vector<8x32xf32>
    %c0_59 = arith.constant 0 : index
    %c0_60 = arith.constant 0 : index
    %c0_61 = arith.constant 0 : index
    %114 = vector.load %arg10[%c0_59, %c0_60, %c0_61] : memref<1x8x32xf32, #tpu.memory_space<vmem>>, vector<1x8x32xf32>
    %115 = vector.shape_cast %114 : vector<1x8x32xf32> to vector<8x32xf32>
    %116 = vector.shape_cast %113 : vector<8x32xf32> to vector<1x8x32xf32>
    tpu.vector_store %arg10[%c0_59, %c0_60, %c0_61], %116 {strides = array<i32>} : memref<1x8x32xf32, #tpu.memory_space<vmem>>, vector<1x8x32xf32>,
    return
  }
  func.func @transform_0(%arg0: i32, %arg1: i32) -> (i32, i32, i32) {
    %c0_i32 = arith.constant 0 : i32
    %c0_i32_0 = arith.constant 0 : i32
    %c0_i32_1 = arith.constant 0 : i32
    return %arg0, %c0_i32, %c0_i32_0 : i32, i32, i32
  }
  func.func @transform_1(%arg0: i32, %arg1: i32) -> (i32, i32, i32) {
    %c0_i32 = arith.constant 0 : i32
    %c0_i32_0 = arith.constant 0 : i32
    %c0_i32_1 = arith.constant 0 : i32
    return %arg0, %c0_i32, %c0_i32_0 : i32, i32, i32
  }
  func.func @transform_2(%arg0: i32, %arg1: i32) -> (i32, i32) {
    %c0_i32 = arith.constant 0 : i32
    %c0_i32_0 = arith.constant 0 : i32
    %c0_i32_1 = arith.constant 0 : i32
    return %c0_i32, %c0_i32_0 : i32, i32
  }
  func.func @transform_3(%arg0: i32, %arg1: i32) -> (i32, i32) {
    %c0_i32 = arith.constant 0 : i32
    %c0_i32_0 = arith.constant 0 : i32
    %c0_i32_1 = arith.constant 0 : i32
    return %c0_i32, %c0_i32_0 : i32, i32
  }
  func.func @transform_4(%arg0: i32, %arg1: i32) -> (i32, i32) {
    %c0_i32 = arith.constant 0 : i32
    %c0_i32_0 = arith.constant 0 : i32
    %c0_i32_1 = arith.constant 0 : i32
    return %c0_i32, %c0_i32_0 : i32, i32
  }
  func.func @transform_5(%arg0: i32, %arg1: i32) -> (i32, i32) {
    %c0_i32 = arith.constant 0 : i32
    %c0_i32_0 = arith.constant 0 : i32
    %c0_i32_1 = arith.constant 0 : i32
    return %c0_i32, %c0_i32_0 : i32, i32
  }
  func.func @transform_6(%arg0: i32, %arg1: i32) -> (i32, i32) {
    %c0_i32 = arith.constant 0 : i32
    %c0_i32_0 = arith.constant 0 : i32
    %c0_i32_1 = arith.constant 0 : i32
    return %c0_i32, %c0_i32_0 : i32, i32
  }
  func.func @transform_7(%arg0: i32, %arg1: i32) -> (i32, i32) {
    %c0_i32 = arith.constant 0 : i32
    %c0_i32_0 = arith.constant 0 : i32
    %c0_i32_1 = arith.constant 0 : i32
    return %c0_i32, %c0_i32_0 : i32, i32
  }
  func.func @transform_8(%arg0: i32, %arg1: i32) -> (i32, i32, i32) {
    %c0_i32 = arith.constant 0 : i32
    %c0_i32_0 = arith.constant 0 : i32
    return %arg0, %arg1, %c0_i32 : i32, i32, i32
  }
}

</mosaic_0001>

<bundles_post_ra>
// kernel: tpu_custom_call.1
= control target key start
LH: loop header
LB: loop body
LE: loop exit
PB: predicated region body
PF: predicated region fallthrough
CT: control target
= control target key end

     0   :  { %s2275_s0 = inlined_call_operand.hbm [shape: bf16[2,8,32], index: 0, kind: input, shape index: {}]   ;;  %s2276_s1 = inlined_call_operand.vmem [shape: f32[2,1,8], index: 1, kind: input, shape index: {}]   ;;  %s2277_s2 = inlined_call_operand.hbm [shape: bf16[32,32], index: 2, kind: input, shape index: {}]   ;;  %s2278_s3 = inlined_call_operand.hbm [shape: f32[1,32], index: 3, kind: input, shape index: {}]   ;;  %s2279_s4 = inlined_call_operand.hbm [shape: bf16[32,32], index: 4, kind: input, shape index: {}]   ;;  %s2280_s5 = inlined_call_operand.vmem [shape: bf16[32,32], index: 5, kind: input, shape index: {}]   ;;  %s2281_s6 = inlined_call_operand.hbm [shape: bf16[32,32], index: 6, kind: input, shape index: {}]   ;;  %s2282_s7 = inlined_call_operand.vmem [shape: f32[1,32], index: 7, kind: input, shape index: {}]   ;;  %s2283_s8 = inlined_call_operand.hbm [shape: f32[2,8,32], index: 8, kind: output, shape index: {}]  }
   0x1   :  { %2301 = sst [smem:[#allocation21_spill]] %s2275_s0 }
   0x2   :  { %2302 = sst [smem:[#allocation22_spill]] %s2277_s2 }
   0x3   :  { %2303 = sst [smem:[#allocation23_spill]] %s2279_s4 }
   0x4   :  { %2304 = sst [smem:[#allocation24_spill]] %s2283_s8 }
   0x5   :  { %13 = vsyncpa [#allocation6], 0 }
   0x6   :  { %14 = vsyncpa [#allocation9], 0 }
   0x7   :  { %15 = vsyncpa [#allocation12], 0 }
   0x8   :  { %16 = vsyncpa [#allocation7], 0 }
   0x9   :  { %18 = vsyncpa [#allocation7 + $0x1], 0  ;;  %s1897_s27 = smov 0   ;;  %s1899_s28 = smov 0  }
   0xa   :  { %s1901_s29 = smov 0   ;;  %s1903_s30 = smov 0  }
   0xb   :  { %s1905_s9 = smov 0   ;;  %s1907_s10 = smov 0  }
   0xc LB: > { %2305 = sst [smem:[#allocation19_spill]] %s1829_s9  ;;  %s1835_s11 = smov [#allocation8]   ;;  %s1833_s10 = sphi %s1907_s10, %s24_s10   ;;  %s1829_s9 = sphi %s1905_s9, %s2331_s9   ;;  %s1825_s30 = sphi %s1903_s30, %s2330_s30   ;;  %s1821_s29 = sphi %s1901_s29, %s2334_s29   ;;  %s1817_s28 = sphi %s1899_s28, %s2333_s28   ;;  %s1813_s27 = sphi %s1897_s27, %s2332_s27  }
   0xd   : > { %s272_s12 = sshll.u32 %s1835_s11, 4  ;;  %s2285_s13 = sadd.s32 4294967295, %s1833_s10   ;;  %s1936_s12 = int_to_ptr.vmem [resolvable:$true] %s272_s12 }
   0xe   : > { %p1299_p0 = scmp.ge.s32.totalorder %s1833_s10, 1  ;;  %p1931_p1 = scmp.eq.s32.totalorder %s2285_s13, 0 }
   0xf   : > { %p247_p2 = scmp.lt.s32.totalorder %s1833_s10, 3  ;;  %s1836_s16 = smov [#allocation11]  }
  0x10   : > { %s2306_s14 = scalar_select %p1931_p1, 1, 0 }
  0x11   : > { %p1938_p3 = pnand %p1299_p0, %p247_p2  ;;  %s296_s17 = sshll.u32 %s1836_s16, 4  ;;  %s1944_s17 = int_to_ptr.vmem [resolvable:$true] %s296_s17 }
  0x12   : > { %s2309_s2 = sld [smem:[#allocation22_spill]] }
  0x13   : > { %s2307_s15 = scalar_select %p1938_p3, 1, 0 }
  0x14   : > { %p2284_p4 = pneg %p1938_p3 }
  0x16   : > { %p1951_p5 = pnand %p2284_p4, %p1931_p1 }
  0x18   : > { %s2308_s18 = scalar_select %p1951_p5, 1, 0 }
  0x19   : > { %s1601_s21 = scalar_lea.hbm %s2309_s2, 256  ;;  %p1963_p7 = pneg %p1951_p5 }
  0x1a   : > { %p1602_p6 = scmp.ne.s32.totalorder %s2309_s2, %s1601_s21  ;;  %p1608_p10 = scmp.lt.u32.totalorder %s1601_s21, %s2309_s2 }
  0x1b   : > { %s2310_s24 = scalar_select %p1963_p7, 1, 0 }
  0x1c   : > { %p1604_p8 = pnand %p1963_p7, %p1602_p6 }
  0x1e   : > { %p1605_p9 = pneg %p1604_p8 }
  0x20   : > { %p1610_p11 = pnand %p1608_p10, %p1605_p9 }
  0x22   : > { %1613 = shalt.err (!%p1610_p11)
}
  0x23   : > { %s1614_s11 = scalar_lea.vmem %s1936_s12, 256  ;;  %p1622_p2 = scmp.lt.s32.totalorder %s1936_s12, %s1936_s12 }
  0x24   : > { %p1615_p12 = scmp.ne.s32.totalorder %s1936_s12, %s1614_s11  ;;  %p1623_p4 = scmp.lt.s32.totalorder %s1614_s11, %s1614_s11 }
  0x26   : > { %p1617_p13 = pnand %p1615_p12, %p1963_p7  ;;  %p1624_p6 = por %p1623_p4, %p1622_p2 }
  0x28   : > { %p1618_p0 = pneg %p1617_p13 }
  0x2a   : > { %p1625_p8 = pnand %p1624_p6, %p1618_p0 }
  0x2c   : > { %1628 = shalt.err (!%p1625_p8)
}
  0x2d   : > { %s2287_s16 = smov 64   ;;  %s2288_s19 = smov 4  }
  0x2e   : > { %1484 = dma.hbm_to_vmem [thread:$0]  (!%p1951_p5), %s2309_s2, 256, %s1936_s12, [#allocation9], %s2287_s16, %s2287_s16, %s2288_s19  }
  0x2f   : > { %s2311_s4 = sld [smem:[#allocation23_spill]] }
  0x35   : > { %s1629_s25 = scalar_lea.hbm %s2311_s4, 256 }
  0x36   : > { %p1630_p4 = scmp.ne.s32.totalorder %s2311_s4, %s1629_s25  ;;  %p1636_p11 = scmp.lt.u32.totalorder %s1629_s25, %s2311_s4 }
  0x38   : > { %p1632_p9 = pnand %p1630_p4, %p1963_p7 }
  0x3a   : > { %p1633_p10 = pneg %p1632_p9 }
  0x3c   : > { %p1638_p12 = pnand %p1636_p11, %p1633_p10 }
  0x3e   : > { %1641 = shalt.err (!%p1638_p12)
}
  0x3f   : > { %s1642_s12 = scalar_lea.vmem %s1944_s17, 256  ;;  %p1650_p6 = scmp.lt.s32.totalorder %s1944_s17, %s1944_s17 }
  0x40   : > { %p1643_p13 = scmp.ne.s32.totalorder %s1944_s17, %s1642_s12  ;;  %p1651_p8 = scmp.lt.s32.totalorder %s1642_s12, %s1642_s12 }
  0x42   : > { %p1645_p0 = pnand %p1643_p13, %p1963_p7  ;;  %p1652_p4 = por %p1651_p8, %p1650_p6 }
  0x44   : > { %p1646_p2 = pneg %p1645_p0 }
  0x46   : > { %p1653_p9 = pnand %p1652_p4, %p1646_p2 }
  0x48   : > { %1656 = shalt.err (!%p1653_p9)
}
  0x49   : > { %1490 = dma.hbm_to_vmem [thread:$0]  (!%p1951_p5), %s2311_s4, 256, %s1944_s17, [#allocation12], %s2287_s16, %s2287_s16, %s2288_s19  }
  0x4a   : > { %s1298_s20 = sadd.s32 4294967294, %s1833_s10   ;;  %s36_s21 = sadd.s32 1, %s1829_s9 }
  0x4b   : > { %s43_s22 = sadd.s32 1, %s1821_s29  ;;  %p38_p10 = scmp.ge.s32.totalorder %s36_s21, 2 }
  0x4c   : > { %p56_p11 = scmp.ne.s32.totalorder %s1817_s28, %s1813_s27  ;;  %p233_p12 = scmp.ne.s32.totalorder %s1821_s29, %s1817_s28 }
  0x4d   : > { %s2312_s23 = sadd.s32 4294967295, %s1833_s10   ;;  %s2336_s21 = smov (%p38_p10, %s36_s21), 0 }
  0x4e   : > { %p234_p13 = scmp.eq.s32.totalorder %s2312_s23, 1  ;;  %2313 = sst [smem:[#allocation20_spill]] %s2336_s21 }
  0x4f   : > { %p2026_p0 = por %p1931_p1, %p56_p11  ;;  %s40_s26 = ssub.s32 %s1829_s9, %s2336_s21 }
  0x50   : > { %p2030_p2 = por %p234_p13, %p233_p12  ;;  %p240_p6 = scmp.eq.s32.totalorder %s1298_s20, 1 }
  0x51   : > { %s2314_s25 = scalar_select %p2026_p0, 1, 0 }
  0x52   : > { %s2315_s17 = scalar_select %p2030_p2, 1, 0 }
  0x53   : > { %p41_p8 = scmp.eq.s32.totalorder %s40_s26, 0  ;;  %s1300_s11 = sshll.u32 %s1825_s30, 6 }
  0x54   : > { %p2037_p4 = por %p240_p6, %p56_p11  ;;  %s2317_s0 = sld [smem:[#allocation21_spill]] }
  0x55   : > { %s2045_s16 = scalar_select %p41_p8, %s1821_s29, %s43_s22  }
  0x56   : > { %s2316_s12 = scalar_select %p2037_p4, 1, 0 }
  0x57   : > { %p2318_p9 = pneg %p1938_p3  ;;  %s1839_s20 = smov [#allocation5]  }
  0x58   : > { %s262_s26 = sshll.u32 %s1839_s20, 4  ;;  %s263_s26 = int_to_ptr.vmem [resolvable:$true] %s262_s26 }
  0x59   : > { %p2052_p10 = pnand %p2318_p9, %p2026_p0 }
  0x5a   : > { %s260_s23 = scalar_lea.hbm %s2317_s0, %s1300_s11  ;;  %s1662_s8 = scalar_lea.hbm %s2317_s0, 128 }
  0x5b   : > { %s1657_s2 = scalar_lea.hbm %s260_s23, 64  ;;  %p1659_p12 = pneg %p2052_p10 }
  0x5c   : > { %p1658_p11 = scmp.ne.s32.totalorder %s260_s23, %s1657_s2  ;;  %p1663_p8 = scmp.lt.u32.totalorder %s260_s23, %s2317_s0 }
  0x5d   : > { %p1664_p9 = scmp.lt.u32.totalorder %s1662_s8, %s1657_s2  ;;  %p1666_p2 = scmp.lt.u32.totalorder %s1657_s2, %s260_s23 }
  0x5e   : > { %p1660_p13 = pnand %p1659_p12, %p1658_p11 }
  0x5f   : > { %p1665_p4 = por %p1664_p9, %p1663_p8 }
  0x60   : > { %p1661_p6 = pneg %p1660_p13 }
  0x61   : > { %p1667_p1 = por %p1666_p2, %p1665_p4 }
  0x63   : > { %p1668_p0 = pnand %p1667_p1, %p1661_p6 }
  0x65   : > { %1671 = shalt.err (!%p1668_p0)
}
  0x66   : > { %s1672_s20 = scalar_lea.vmem %s263_s26, 64  ;;  %p1680_p5 = scmp.lt.s32.totalorder %s263_s26, %s263_s26 }
  0x67   : > { %p1673_p3 = scmp.ne.s32.totalorder %s263_s26, %s1672_s20  ;;  %p1681_p7 = scmp.lt.s32.totalorder %s1672_s20, %s1672_s20 }
  0x69   : > { %p1675_p11 = pnand %p1673_p3, %p1659_p12  ;;  %p1682_p8 = por %p1681_p7, %p1680_p5 }
  0x6b   : > { %p1676_p13 = pneg %p1675_p11 }
  0x6d   : > { %p1683_p9 = pnand %p1682_p8, %p1676_p13 }
  0x6f   : > { %1686 = shalt.err (!%p1683_p9)
}
  0x70   : > { %1481 = dma.hbm_to_vmem [thread:$0]  (!%p2052_p10), %s260_s23, 64, %s263_s26, [#allocation6]  }
  0x71   : > { %s1840_s2 = smov [#allocation10]   ;;  %s1841_s22 = smov [#allocation13]  }
  0x72   : > { %s286_s4 = sshll.u32 %s1840_s2, 4  ;;  %s312_s11 = sshll.u32 %s1841_s22, 4  ;;  %s287_s4 = int_to_ptr.vmem [resolvable:$true] %s286_s4  ;;  %s313_s11 = int_to_ptr.vmem [resolvable:$true] %s312_s11 }
  0x73   : > { %s1687_s0 = scalar_lea.hbm %s2278_s3, 16  ;;  %p2320_p3 = scmp.ne.s32.totalorder %s2310_s24, 0 }
  0x74   : > { %p1688_p1 = scmp.ne.s32.totalorder %s2278_s3, %s1687_s0  ;;  %p1694_p0 = scmp.lt.u32.totalorder %s1687_s0, %s2278_s3 }
  0x76   : > { %p1690_p5 = pnand %p1688_p1, %p2320_p3 }
  0x78   : > { %p1691_p7 = pneg %p1690_p5 }
  0x7a   : > { %p1696_p2 = pnand %p1694_p0, %p1691_p7 }
  0x7c   : > { %1699 = shalt.err (!%p1696_p2)
}
  0x7d   : > { %s1700_s23 = scalar_lea.vmem %s287_s4, 16  ;;  %s1707_s26 = scalar_lea.vmem %s287_s4, 32 }
  0x7e   : > { %p1701_p4 = scmp.ne.s32.totalorder %s287_s4, %s1700_s23  ;;  %p1708_p6 = scmp.lt.s32.totalorder %s287_s4, %s287_s4 }
  0x7f   : > { %p1709_p11 = scmp.lt.s32.totalorder %s1707_s26, %s1700_s23 }
  0x80   : > { %p1703_p10 = pnand %p1701_p4, %p2320_p3 }
  0x81   : > { %p1710_p13 = por %p1709_p11, %p1708_p6 }
  0x82   : > { %p1704_p12 = pneg %p1703_p10 }
  0x84   : > { %p1711_p8 = pnand %p1710_p13, %p1704_p12 }
  0x86   : > { %1714 = shalt.err (!%p1711_p8)
}
  0x87   : > { %p2321_p9 = scmp.ne.s32.totalorder %s2308_s18, 0  ;;  %s1715_s22 = scalar_lea.hbm %s2281_s6, 256 }
  0x88   : > { %p1716_p1 = scmp.ne.s32.totalorder %s2281_s6, %s1715_s22  ;;  %p1722_p0 = scmp.lt.u32.totalorder %s1715_s22, %s2281_s6 }
  0x89   : > { %1487 = dma.hbm_to_vmem [thread:$0]  (!%p2321_p9), %s2278_s3, 16, %s287_s4, [#allocation9]  }
  0x8a   : > { %p1718_p5 = pnand %p1716_p1, %p2320_p3 }
  0x8c   : > { %p1719_p7 = pneg %p1718_p5 }
  0x8e   : > { %p1724_p2 = pnand %p1722_p0, %p1719_p7 }
  0x90   : > { %1727 = shalt.err (!%p1724_p2)
}
  0x91   : > { %s1728_s23 = scalar_lea.vmem %s313_s11, 256  ;;  %p1736_p6 = scmp.lt.s32.totalorder %s313_s11, %s313_s11 }
  0x92   : > { %p1729_p4 = scmp.ne.s32.totalorder %s313_s11, %s1728_s23  ;;  %p1737_p11 = scmp.lt.s32.totalorder %s1728_s23, %s1728_s23 }
  0x94   : > { %p1731_p10 = pnand %p1729_p4, %p2320_p3  ;;  %p1738_p13 = por %p1737_p11, %p1736_p6 }
  0x96   : > { %p1732_p12 = pneg %p1731_p10 }
  0x98   : > { %p1739_p8 = pnand %p1738_p13, %p1732_p12 }
  0x9a   : > { %1742 = shalt.err (!%p1739_p8)
}
  0x9b   : > { %s2322_s4 = smov 4   ;;  %s2323_s26 = smov 64  }
  0x9c   : > { %1493 = dma.hbm_to_vmem [thread:$0]  (!%p2321_p9), %s2281_s6, 256, %s313_s11, [#allocation12], %s2323_s26, %s2323_s26, %s2322_s4  }
  0x9d   : > { %p2324_p1 = scmp.ne.s32.totalorder %s2307_s15, 0 }
  0x9e   : > { %p2325_p3 = scmp.ne.s32.totalorder (!%p2324_p1), %s2314_s25, 0 }
  0x9f   : > { %337 = sbr.rel (%p2324_p1) target bundleno = 1640 (0x668), region = 52 }
  0xa6   : > { %1796 = dma.done.wait (%p2325_p3), [#allocation6], 64  }
  0xa7   : > { %1798 = vsyncadd (%p2325_p3), [#allocation6], 4294967232  ;;  %p2326_p5 = scmp.ne.s32.totalorder %s2306_s14, 0 }
  0xa9   : > { %1800 = dma.done.wait (%p2326_p5), [#allocation9], 272  }
  0xaa   : > { %1802 = vsyncadd (%p2326_p5), [#allocation9], 4294967024 }
  0xab   : > { %1804 = dma.done.wait (%p2326_p5), [#allocation12], 512  }
  0xac   : > { %1806 = vsyncadd (%p2326_p5), [#allocation12], 4294966784  ;;  %v1842_v0 = vmov 0.0   ;;  %vm1843_vm0 = vmmov 0   ;;  %v1571_v1 = vld [vmem:[#allocation11] sm:$0xff]   ;;  %v1572_v2 = vld [vmem:[#allocation11 + $0x8] sm:$0xff]   ;;  %v642_v43 = vlaneseq }
  0xad   : > { %1378 = vmatprep.subr.bf16.mxu0 %v1842_v0  ;;  %1382 = vmatprep.mubr.msk.bf16.mxu0 %vm1843_vm0, %v1842_v0  ;;  %v393_v3 = vld [vmem:[#allocation5] sm:$0xf]  ;;  %v1573_v4 = vld [vmem:[#allocation8] sm:$0xff]   ;;  %vm410_vm1 = vcmask 261120   ;;  %v1574_v6 = vld [vmem:[#allocation8 + $0x8] sm:$0xff]   ;;  %vm455_vm2 = vcmask 257024  }
  0xae   : > { %1386 = vmatprep.subr.bf16.mxu1 %v1842_v0  ;;  %1390 = vmatprep.mubr.msk.bf16.mxu1 %vm1843_vm0, %v1842_v0  ;;  %v1575_v5 = vld [vmem:[%s2280_s5] sm:$0xff]   ;;  %v520_v7 = vld [vmem:[#allocation5] sm:$0xf]  ;;  %v1576_v8 = vld [vmem:[%s2280_s5 + $0x8] sm:$0xff]   ;;  %vm594_vm3 = vcmask 64512   ;;  %s1844_s25 = smov 112  }
  0xaf   : > { %1379 = vmatpush3.bf16.msra.mxu0 %v1571_v1  ;;  %1387 = vmatpush3.bf16.msra.mxu1 %v1575_v5  ;;  %v1318_v14 = vld [vmem:[#allocation10] ss:$0 sm:$0xff]  ;;  %s1845_s11 = smov 120   ;;  %s1846_s0 = smov 104   ;;  %vm663_vm4 = vcmask 1043456   ;;  %v643_v45 = vshrl.u32 %v642_v43, 7 }
  0xb0   : > { %1380 = vmatprep.subr.bf16.mxu0 %v1842_v0  ;;  %1388 = vmatprep.subr.bf16.mxu1 %v1842_v0  ;;  %p385_p9 = scmp.lt.s32.totalorder %s1825_s30, 1  ;;  %v1847_v47 = vmov 0   ;;  %vm708_vm7 = vcmask 60416   ;;  %s1848_s20 = smov 8   ;;  %vm837_vm8 = vcmask 126016   ;;  %vm965_vm9 = vcmask 191616  }
  0xb1   : > { %v644_v46 = vsub.s32 0, %v643_v45  ;;  %s1849_s19 = smov 16   ;;  %s1850_s23 = smov 24   ;;  %vm1093_vm10 = vcmask 257216  }
  0xb2   : > { %s386_s2 = scalar_select %p385_p9, %s1825_s30, 1 }
  0xb3   : > { %1381 = vmatpush3.bf16.msra.mxu0 %v1572_v2  ;;  %1389 = vmatpush3.bf16.msra.mxu1 %v1576_v8  ;;  %s382_s4 = sand.u32 1, %s1817_s28   ;;  %s1344_s14 = sshll.u32 %s1825_s30, 7 }
  0xb4   : > { %1394 = vmatprep.subr.bf16.mxu0 %v1842_v0  ;;  %1402 = vmatprep.subr.bf16.mxu1 %v1842_v0  ;;  %s387_s13 = scalar_lea.vmem %s2276_s1, %s386_s2  ;;  %s1311_s26 = sshll.u32 %s382_s4, 3 }
  0xb5   : > { %v590_v44 = vld [vmem:[%s387_s13] sm:$0x1]  ;;  %s384_s15 = scalar_lea.vmem [#allocation14], %s1311_s26  ;;  %s1164_s30 = scalar_lea.sflag [#allocation7], %s382_s4 }
  0xb6   : > { %1383 = vmatmul.mubr.msk.bf16.vlgmr.msra.gmra.mrb[0].mxu0 %vm410_vm1, %v393_v3  ;;  %1391 = vmatmul.mubr.msk.bf16.vlgmr.msra.gmra.mrb[0].mxu1 %vm410_vm1, %v393_v3  ;;  %vm591_vm5 = vcmp.gt.f32.partialorder %v590_v44, 0.5  ;;  %s1178_s18 = sshll.u32 %s384_s15, 4  ;;  %p2328_p0 = scmp.ne.s32.totalorder %s2315_s17, 0  ;;  %s2229_s18 = int_to_ptr.vmem [resolvable:$true] %s1178_s18 }
  0xb7   : > { %1395 = vmatpush3.bf16.msra.mxu0 %v1573_v4  ;;  %1398 = vmatprep.mubr.msk.bf16.mxu0 %vm1843_vm0, %v1842_v0  ;;  %v641_v48 = vsel %vm591_vm5, 1, %v1847_v47  ;;  %s1743_s2 = scalar_lea.vmem %s2229_s18, 128  ;;  %s1851_s22 = smov [#allocation14]  }
  0xb8   : > { %1396 = vmatprep.subr.bf16.mxu0 %v1842_v0  ;;  %1404 = vmatprep.mubr.msk.bf16.mxu1 %vm1843_vm0, %v1842_v0  ;;  %v645_v49 = vrot.slane %v641_v48, %v644_v46  ;;  %p1744_p7 = scmp.ne.s32.totalorder %s2229_s18, %s1743_s2  ;;  %s1747_s8 = sshll.u32 %s1851_s22, 4  ;;  %s1748_s8 = int_to_ptr.vmem [resolvable:$false] %s1747_s8 }
  0xb9   : > { %s1749_s13 = scalar_lea.vmem %s1748_s8, 256  ;;  %p1750_p10 = scmp.lt.s32.totalorder %s2229_s18, %s1748_s8 }
  0xba   : > { %vm646_vm6 = vcmp.eq.s32.totalorder %v645_v49, 1  ;;  %p1745_p2 = pnand %p1744_p7, %p2328_p0  ;;  %p1751_p12 = scmp.lt.s32.totalorder %s1749_s13, %s1743_s2 }
  0xbb   : > { %1397 = vmatpush3.bf16.msra.mxu0 %v1574_v6 }
  0xbc   : > { %1408 = vmatprep.subr.bf16.mxu0 %v1842_v0  ;;  %p1746_p4 = pneg %p1745_p2  ;;  %p1752_p6 = por %p1751_p12, %p1750_p10 }
  0xbe   : > { %1399 = vmatmul.mubr.msk.bf16.vlgmr.msra.gmra.mrb[4].mxu0 %vm410_vm1, %v520_v7  ;;  %p1753_p11 = pnand %p1752_p6, %p1746_p4 }
  0xbf   : > { %1410 = vmatprep.mubr.msk.bf16.mxu0 %vm1843_vm0, %v1842_v0 }
 0x189   : > { %v448_v9 = vpop.f32.mrb[0].mxu0  ;;  %v507_v27 = vpop.f32.mrb[0].mxu1 }
 0x18a   : > { %v454_v10 = vpack.c.bf16 %v448_v9, %v448_v9  ;;  %v1384_v11 = vpop.f32.mrb[1].mxu0  ;;  %v513_v28 = vpack.c.bf16 %v507_v27, %v507_v27  ;;  %v1392_v29 = vpop.f32.mrb[1].mxu1 }
 0x18b   : > { %v451_v12 = vpop.f32.mrb[2].mxu0  ;;  %v510_v30 = vpop.f32.mrb[2].mxu1 }
 0x18c   : > { %456 = vst.msk [vmem:[#allocation2] sm:$0xf] %vm455_vm2, %v454_v10  ;;  %v1385_v13 = vpop.f32.mrb[3].mxu0  ;;  %514 = vst.msk [vmem:[#allocation3] sm:$0xf] %vm455_vm2, %v513_v28  ;;  %v1393_v31 = vpop.f32.mrb[3].mxu1 }
 0x191   : > { %v582_v15 = vpop.f32.mrb[4].mxu0 }
 0x192   : > { %v583_v16 = vadd.f32 %v1318_v14, %v582_v15  ;;  %v1400_v17 = vpop.f32.mrb[5].mxu0 }
 0x193   : > { %v592_v18 = vld [vmem:[#allocation2] sm:$0xf]  ;;  %v585_v22 = vpop.f32.mrb[6].mxu0  ;;  %v593_v32 = vld [vmem:[#allocation3] sm:$0xf] }
 0x194   : > { %v1577_v19 = vld [vmem:[#allocation2] ss:$0 sps:$4 sm:$0xff]   ;;  %v588_v20 = vmul.f32 0.17677669, %v583_v16  ;;  %v599_v21 = vsel %vm594_vm3, %v592_v18, 0  ;;  %v1401_v24 = vpop.f32.mrb[7].mxu0 }
 0x195   : > { %1403 = vmatpush3.bf16.xpose.msra.mxu1 %v599_v21  ;;  %846 = vrot.lane.b32.xlu1 %v1577_v19, %s1844_s25  ;;  %v1578_v23 = vld [vmem:[#allocation2] ss:$0 sps:$4 sm:$0xff]   ;;  %v665_v33 = vsel %vm663_vm4, %v593_v32, 0  ;;  %v1580_v16 = vld [vmem:[#allocation3] ss:$0 sps:$4 sm:$0xff]  }
 0x196   : > { %v589_v25 = vpack.c.bf16 %v588_v20, %v588_v20  ;;  %1414 = vmatprep.subr.bf16.mxu1 %v1842_v0  ;;  %718 = vrot.lane.b32.xlu0 %v1578_v23, %s1845_s11  ;;  %v1579_v26 = vld [vmem:[#allocation2] ss:$0 sps:$4 sm:$0xff]  }
 0x197   : > { %1409 = vmatpush3.bf16.msra.mxu0 %v665_v33  ;;  %v1581_v33 = vld [vmem:[#allocation3] ss:$0 sps:$4 sm:$0xff]  }
 0x198   : > { %1420 = vmatprep.subr.bf16.mxu0 %v1842_v0 }
 0x199   : > { %841 = vrot.lane.b32.xlu1 %v589_v25, %s1844_s25 }
 0x19a   : > { %713 = vrot.lane.b32.xlu0 %v589_v25, %s1845_s11 }
 0x19c   : > { %1405 = vmatmul.mubr.msk.bf16.vlgmr.msra.gmra.mrb[4].mxu1 %vm594_vm3, %v589_v25 }
 0x19d   : > { %969 = vrot.lane.b32.xlu1 %v589_v25, %s1846_s0  ;;  %1416 = vmatprep.mubr.msk.bf16.mxu1 %vm1843_vm0, %v1842_v0 }
 0x19e   : > { %974 = vrot.lane.b32.xlu0 %v1579_v26, %s1846_s0 }
 0x207   : > { %v847_v36 = vpop.permute.xlu1 %846 }
 0x208   : > { %v719_v34 = vpop.permute.xlu0 %718  ;;  %v852_v38 = vsel %vm594_vm3, %v847_v36, 0 }
 0x209   : > { %v724_v35 = vsel %vm594_vm3, %v719_v34, 0 }
 0x20a   : > { %1415 = vmatpush3.bf16.xpose.msra.mxu1 %v724_v35 }
 0x20b   : > { %1426 = vmatprep.subr.bf16.mxu1 %v1842_v0  ;;  %v842_v40 = vpop.permute.xlu1 %841 }
 0x20c   : > { %v714_v37 = vpop.permute.xlu0 %713 }
 0x20f   : > { %v970_v42 = vpop.permute.xlu1 %969 }
 0x210   : > { %v975_v39 = vpop.permute.xlu0 %974 }
 0x211   : > { %1417 = vmatmul.mubr.msk.bf16.vlgmr.msra.gmra.mrb[8].mxu1 %vm594_vm3, %v714_v37  ;;  %v980_v41 = vsel %vm594_vm3, %v975_v39, 0  ;;  %v1582_v37 = vld [vmem:[#allocation3] ss:$0 sps:$4 sm:$0xff]  }
 0x212   : > { %1427 = vmatpush3.bf16.xpose.msra.mxu1 %v852_v38  ;;  %1428 = vmatprep.mubr.msk.bf16.mxu1 %vm1843_vm0, %v1842_v0 }
 0x213   : > { %1438 = vmatprep.subr.bf16.mxu1 %v1842_v0 }
 0x219   : > { %1429 = vmatmul.mubr.msk.bf16.vlgmr.msra.gmra.mrb[12].mxu1 %vm594_vm3, %v842_v40 }
 0x21a   : > { %1439 = vmatpush3.bf16.xpose.msra.mxu1 %v980_v41  ;;  %1440 = vmatprep.mubr.msk.bf16.mxu1 %vm1843_vm0, %v1842_v0 }
 0x21b   : > { %1450 = vmatprep.subr.bf16.mxu1 %v1842_v0 }
 0x221   : > { %1441 = vmatmul.mubr.msk.bf16.vlgmr.msra.gmra.mrb[16].mxu1 %vm594_vm3, %v970_v42 }
 0x222   : > { %1454 = vmatprep.mubr.msk.bf16.mxu1 %vm1843_vm0, %v1842_v0 }
 0x26f   : > { %v635_v50 = vpop.f32.mrb[4].mxu1 }
 0x270   : > { %v647_v51 = vsel %vm646_vm6, %v635_v50, -3.4028235e+38  ;;  %v1406_v52 = vpop.f32.mrb[5].mxu1 }
 0x271   : > { %v638_v53 = vpop.f32.mrb[6].mxu1  ;;  %v648_v54 = vsel %vm594_vm3, %v647_v51, -inf }
 0x272   : > { %649 = vmax.xlane.f32.xlu0 %v648_v54  ;;  %v1407_v55 = vpop.f32.mrb[7].mxu1 }
 0x2e4   : > { %v760_v56 = vpop.f32.mrb[8].mxu1 }
 0x2e5   : > { %v766_v57 = vsel %vm646_vm6, %v760_v56, -3.4028235e+38  ;;  %v1418_v58 = vpop.f32.mrb[9].mxu1 }
 0x2e6   : > { %v763_v59 = vpop.f32.mrb[10].mxu1  ;;  %v767_v60 = vsel %vm594_vm3, %v766_v57, -inf }
 0x2e7   : > { %768 = vmax.xlane.f32.xlu1 %v767_v60  ;;  %v1419_v61 = vpop.f32.mrb[11].mxu1 }
 0x2ec   : > { %v888_v62 = vpop.f32.mrb[12].mxu1 }
 0x2ed   : > { %v894_v63 = vsel %vm646_vm6, %v888_v62, -3.4028235e+38  ;;  %v1430_v1 = vpop.f32.mrb[13].mxu1 }
 0x2ee   : > { %v891_v2 = vpop.f32.mrb[14].mxu1  ;;  %v895_v3 = vsel %vm594_vm3, %v894_v63, -inf }
 0x2ef   : > { %896 = vmax.xlane.f32.xlu0 %v895_v3  ;;  %v1431_v4 = vpop.f32.mrb[15].mxu1  ;;  %v1583_v3 = vld [vmem:[#allocation13] sm:$0xff]  }
 0x2f0   : > { %1451 = vmatpush3.bf16.msra.mxu1 %v1583_v3 }
 0x2f1   : > { %1452 = vmatprep.subr.bf16.mxu1 %v1842_v0 }
 0x2f4   : > { %v1016_v5 = vpop.f32.mrb[16].mxu1 }
 0x2f5   : > { %v1022_v6 = vsel %vm646_vm6, %v1016_v5, -3.4028235e+38  ;;  %v1442_v7 = vpop.f32.mrb[17].mxu1  ;;  %v1584_v5 = vld [vmem:[#allocation13 + $0x8] sm:$0xff]  }
 0x2f6   : > { %v1019_v8 = vpop.f32.mrb[18].mxu1  ;;  %v1023_v9 = vsel %vm594_vm3, %v1022_v6, -inf  ;;  %1453 = vmatpush3.bf16.msra.mxu1 %v1584_v5 }
 0x2f7   : > { %1024 = vmax.xlane.f32.xlu0 %v1023_v9  ;;  %v1443_v10 = vpop.f32.mrb[19].mxu1 }
 0x2ff   : > { %v650_v11 = vpop.xlane.xlu0 %649 }
 0x300   : > { %v651_v12 = vsub.f32 %v647_v51, %v650_v11 }
 0x302   : > { %v652_v13 = vmul.f32 1.442695, %v651_v12 }
 0x304   : > { %1585 = vpow2.f32 %v652_v13 }
 0x30e   : > { %v1586_v14 = vpop.eup %1585 }
 0x30f   : > { %v654_v15 = vsel %vm594_vm3, %v1586_v14, 0.0 }
 0x310   : > { %655 = vadd.xlane.f32.xlu1 %v654_v15 }
 0x321   : > { %782 = vrot.lane.b32.xlu1 %v1580_v16, %s1845_s11  ;;  %s2327_s11 = sld [smem:[#allocation24_spill]] }
 0x374   : > { %v769_v17 = vpop.xlane.xlu1 %768 }
 0x375   : > { %v770_v18 = vsub.f32 %v766_v57, %v769_v17 }
 0x377   : > { %v771_v19 = vmul.f32 1.442695, %v770_v18  ;;  %v1339_v18 = vld [vmem:[%s2282_s7] ss:$0 sm:$0xff] }
 0x379   : > { %1587 = vpow2.f32 %v771_v19 }
 0x37c   : > { %v897_v20 = vpop.xlane.xlu0 %896 }
 0x37d   : > { %v898_v21 = vsub.f32 %v894_v63, %v897_v20 }
 0x37f   : > { %v899_v22 = vmul.f32 1.442695, %v898_v21 }
 0x381   : > { %1589 = vpow2.f32 %v899_v22 }
 0x383   : > { %v1588_v23 = vpop.eup %1587 }
 0x384   : > { %v1025_v24 = vpop.xlane.xlu0 %1024  ;;  %v773_v25 = vsel %vm594_vm3, %v1588_v23, 0.0 }
 0x385   : > { %v1026_v26 = vsub.f32 %v1022_v6, %v1025_v24  ;;  %774 = vadd.xlane.f32.xlu0 %v773_v25 }
 0x387   : > { %v1027_v27 = vmul.f32 1.442695, %v1026_v26 }
 0x389   : > { %1591 = vpow2.f32 %v1027_v27 }
 0x38b   : > { %v1590_v28 = vpop.eup %1589 }
 0x38c   : > { %v901_v29 = vsel %vm594_vm3, %v1590_v28, 0.0 }
 0x38d   : > { %902 = vadd.xlane.f32.xlu1 %v901_v29 }
 0x393   : > { %v1592_v30 = vpop.eup %1591 }
 0x394   : > { %v1029_v31 = vsel %vm594_vm3, %v1592_v30, 0.0 }
 0x395   : > { %1030 = vadd.xlane.f32.xlu0 %v1029_v31 }
 0x39d   : > { %v656_v32 = vpop.xlane.xlu1 %655 }
 0x39e   : > { %1593 = vrcp.f32 %v656_v32  ;;  %1038 = vrot.lane.b32.xlu1 %v1581_v33, %s1846_s0  ;;  %s2227_s0 = scalar_lea.hbm %s2327_s11, %s1344_s14 }
 0x3a1   : > { %v783_v36 = vpop.permute.xlu1 %782 }
 0x3a2   : > { %v788_v39 = vsel %vm663_vm4, %v783_v36, 0 }
 0x3a8   : > { %v1594_v34 = vpop.eup %1593 }
 0x3a9   : > { %v658_v35 = vmul.f32 %v1594_v34, %v1586_v14 }
 0x3ab   : > { %v659_v38 = vpack.c.bf16 %v658_v35, %v658_v35  ;;  %910 = vrot.lane.b32.xlu0 %v1582_v37, %s1844_s25 }
 0x3ad   : > { %1411 = vmatmul.mubr.msk.bf16.vlgmr.msra.gmra.mrb[8].mxu0 %vm594_vm3, %v659_v38 }
 0x3ae   : > { %1421 = vmatpush3.bf16.msra.mxu0 %v788_v39  ;;  %1422 = vmatprep.mubr.msk.bf16.mxu0 %vm1843_vm0, %v1842_v0 }
 0x3af   : > { %1432 = vmatprep.subr.bf16.mxu0 %v1842_v0 }
 0x412   : > { %v775_v40 = vpop.xlane.xlu0 %774 }
 0x413   : > { %1595 = vrcp.f32 %v775_v40 }
 0x41a   : > { %v903_v41 = vpop.xlane.xlu1 %902 }
 0x41b   : > { %1597 = vrcp.f32 %v903_v41 }
 0x41d   : > { %v1596_v42 = vpop.eup %1595 }
 0x41e   : > { %v777_v43 = vmul.f32 %v1596_v42, %v1588_v23  ;;  %v1039_v50 = vpop.permute.xlu1 %1038 }
 0x41f   : > { %v1044_v52 = vsel %vm663_vm4, %v1039_v50, 0 }
 0x420   : > { %v778_v44 = vpack.c.bf16 %v777_v43, %v777_v43 }
 0x422   : > { %1423 = vmatmul.mubr.msk.bf16.vlgmr.msra.gmra.mrb[12].mxu0 %vm594_vm3, %v778_v44  ;;  %v1031_v45 = vpop.xlane.xlu0 %1030 }
 0x423   : > { %1599 = vrcp.f32 %v1031_v45  ;;  %1434 = vmatprep.mubr.msk.bf16.mxu0 %vm1843_vm0, %v1842_v0 }
 0x425   : > { %v1598_v46 = vpop.eup %1597 }
 0x426   : > { %v905_v47 = vmul.f32 %v1598_v46, %v1590_v28  ;;  %v911_v48 = vpop.permute.xlu0 %910 }
 0x427   : > { %v916_v49 = vsel %vm663_vm4, %v911_v48, 0 }
 0x428   : > { %1433 = vmatpush3.bf16.msra.mxu0 %v916_v49  ;;  %v906_v51 = vpack.c.bf16 %v905_v47, %v905_v47 }
 0x429   : > { %1444 = vmatprep.subr.bf16.mxu0 %v1842_v0 }
 0x42b   : > { %1435 = vmatmul.mubr.msk.bf16.vlgmr.msra.gmra.mrb[16].mxu0 %vm594_vm3, %v906_v51 }
 0x42c   : > { %1445 = vmatpush3.bf16.msra.mxu0 %v1044_v52  ;;  %1446 = vmatprep.mubr.msk.bf16.mxu0 %vm1843_vm0, %v1842_v0 }
 0x42d   : > { %v1600_v53 = vpop.eup %1599 }
 0x42e   : > { %v1033_v54 = vmul.f32 %v1600_v53, %v1592_v30 }
 0x430   : > { %v1034_v55 = vpack.c.bf16 %v1033_v54, %v1033_v54 }
 0x433   : > { %1447 = vmatmul.mubr.msk.bf16.vlgmr.msra.gmra.mrb[20].mxu0 %vm594_vm3, %v1034_v55 }
 0x480   : > { %v701_v56 = vpop.f32.mrb[8].mxu0 }
 0x481   : > { %v707_v57 = vpack.c.bf16 %v701_v56, %v701_v56  ;;  %v1412_v58 = vpop.f32.mrb[9].mxu0 }
 0x482   : > { %v704_v59 = vpop.f32.mrb[10].mxu0 }
 0x483   : > { %709 = vst.msk [vmem:[#allocation4] sm:$0xf] %vm708_vm7, %v707_v57  ;;  %v1413_v60 = vpop.f32.mrb[11].mxu0 }
 0x4f5   : > { %v824_v61 = vpop.f32.mrb[12].mxu0 }
 0x4f6   : > { %v1347_v62 = vpack.c.bf16 %v824_v61, %v824_v61  ;;  %v1424_v63 = vpop.f32.mrb[13].mxu0 }
 0x4f7   : > { %v827_v1 = vpop.f32.mrb[14].mxu0 }
 0x4f8   : > { %834 = vrot.lane.b32.xlu1 %v1347_v62, %s1848_s20  ;;  %v1425_v2 = vpop.f32.mrb[15].mxu0 }
 0x4fe   : > { %v952_v4 = vpop.f32.mrb[16].mxu0 }
 0x4ff   : > { %v1348_v6 = vpack.c.bf16 %v952_v4, %v952_v4  ;;  %v1436_v7 = vpop.f32.mrb[17].mxu0 }
 0x500   : > { %v955_v8 = vpop.f32.mrb[18].mxu0 }
 0x501   : > { %962 = vrot.lane.b32.xlu0 %v1348_v6, %s1849_s19  ;;  %v1437_v9 = vpop.f32.mrb[19].mxu0 }
 0x506   : > { %v1080_v10 = vpop.f32.mrb[20].mxu0 }
 0x507   : > { %v1349_v11 = vpack.c.bf16 %v1080_v10, %v1080_v10  ;;  %v1448_v12 = vpop.f32.mrb[21].mxu0 }
 0x508   : > { %v1083_v13 = vpop.f32.mrb[22].mxu0 }
 0x509   : > { %1090 = vrot.lane.b32.xlu1 %v1349_v11, %s1850_s23  ;;  %v1449_v14 = vpop.f32.mrb[23].mxu0 }
 0x56a   : > { %v835_v15 = vpop.permute.xlu1 %834 }
 0x56b   : > { %838 = vst.msk [vmem:[#allocation4] sm:$0xf] %vm837_vm8, %v835_v15 }
 0x573   : > { %v963_v16 = vpop.permute.xlu0 %962 }
 0x574   : > { %966 = vst.msk [vmem:[#allocation4] sm:$0xf] %vm965_vm9, %v963_v16 }
 0x57b   : > { %v1091_v0 = vpop.permute.xlu1 %1090 }
 0x57c   : > { %1094 = vst.msk [vmem:[#allocation4] sm:$0xf] %vm1093_vm10, %v1091_v0 }
 0x583   : > { %v1095_v17 = vld [vmem:[#allocation4] sm:$0xf] }
 0x584   : > { %1455 = vmatmul.mubr.msk.bf16.vlgmr.msra.gmra.mrb[20].mxu1 %vm410_vm1, %v1095_v17 }
 0x657   : > { %v1156_v19 = vpop.f32.mrb[20].mxu1 }
 0x658   : > { %v1157_v20 = vadd.f32 %v1339_v18, %v1156_v19  ;;  %v1456_v21 = vpop.f32.mrb[21].mxu1 }
 0x659   : > { %v1159_v22 = vpop.f32.mrb[22].mxu1 }
 0x65a   : > { %v1457_v23 = vpop.f32.mrb[23].mxu1  ;;  %1162 = vst.msk [vmem:[%s384_s15] sm:$0xff] %vm410_vm1, %v1157_v20 }
 0x65b   : > { %1756 = shalt.err (!%p1753_p11)
}
 0x65c   : > { %s1757_s20 = scalar_lea.hbm %s2227_s0, 128  ;;  %s1761_s4 = scalar_lea.hbm %s2327_s11, 256 }
 0x65d   : > { %p1758_p13 = scmp.ne.s32.totalorder %s2227_s0, %s1757_s20  ;;  %p1762_p3 = scmp.lt.u32.totalorder %s2227_s0, %s2327_s11 }
 0x65e   : > { %p1763_p5 = scmp.lt.u32.totalorder %s1761_s4, %s1757_s20  ;;  %p1765_p7 = scmp.lt.u32.totalorder %s1757_s20, %s2227_s0 }
 0x65f   : > { %p1759_p8 = pnand %p1758_p13, %p2328_p0 }
 0x660   : > { %p1764_p9 = por %p1763_p5, %p1762_p3 }
 0x661   : > { %p1760_p1 = pneg %p1759_p8 }
 0x662   : > { %p1766_p2 = por %p1765_p7, %p1764_p9 }
 0x664   : > { %p1767_p4 = pnand %p1766_p2, %p1760_p1 }
 0x666   : > { %1770 = shalt.err (!%p1767_p4)
}
 0x667   : > { %1476 = dma.vmem_to_hbm [thread:$0]  (%p2328_p0), %s2229_s18, 128, %s2227_s0, %s1164_s30  }
 0x668 PF: > { %p1506_p10 = scmp.ge.s32.totalorder %s1833_s10, 2  ;;  %s1190_s21 = sand.u32 1, %s1813_s27  }
 0x669   : > { %p2329_p12 = scmp.ne.s32.totalorder %s2316_s12, 0  ;;  %s1191_s14 = scalar_lea.sflag [#allocation7], %s1190_s21 }
 0x66b   : > { %p1495_p6 = pnand %p1506_p10, %p2329_p12 }
 0x66d   : > { %1808 = dma.done.wait (!%p1495_p6), %s1191_s14, 128  }
 0x66e   : > { %1810 = vsyncadd (!%p1495_p6), %s1191_s14, 4294967168  ;;  %s24_s10 = sadd.s32 1, %s1833_s10   ;;  %s2330_s30 = sld [smem:[#allocation19_spill]] }
 0x66f   : > { %p21_p11 = scmp.ge.s32.totalorder %s24_s10, 4   ;;  %s2331_s9 = sld [smem:[#allocation20_spill]] }
 0x670   : > { %s2332_s27 = smov %s1817_s28  ;;  %s2333_s28 = smov %s1821_s29 }
 0x671   : > { %s2334_s29 = smov %s2045_s16  ;;  %23 = sbr.rel (!%p21_p11) target bundleno = 12 (0xc), region = 114 }
 0x678   :  { %1196 = vsyncpa [#allocation6], 1 }
 0x679   :  { %1198 = vsyncpa [#allocation6 + $0x1], 1 }
 0x67a   :  { %1199 = vsyncpa [#allocation9], 1 }
 0x67b   :  { %1200 = vsyncpa [#allocation12], 1 }
 0x67c   :  { %1201 = vsyncpa [#allocation7], 1 }
 0x67d   :  { %1203 = vsyncpa [#allocation7 + $0x1], 1 }

</bundles_post_ra>
